<compile_context>
chip_gen: v7x
topology: tpu7x:2x2x1
jax: 0.10.0
libtpu: 0.0.40
codegen_flags: <defaults>
</compile_context>

<pallas_src>
import jax
import jax.numpy as jnp
from jax.experimental import pallas as pl
from jax.experimental.pallas import tpu as pltpu

_LANE = 128
_SUBLANE = 8


def _cosine_sim_kernel(x_ref, w_ref, o_ref):
    # x_ref : (TN, D)       current tile of features (native dtype), streamed over grid
    # w_ref : (D, C_pad)    pre-normalized, pre-scaled, pre-transposed weight (resident)
    # o_ref : (TN, C_pad)   scaled cosine scores for this tile
    x = x_ref[...].astype(jnp.float32)

    # 1 / (||x||_2 + 1e-5), one scalar per row.
    inv_norm = pl.reciprocal(
        jnp.sqrt(jnp.sum(x * x, axis=1, keepdims=True)) + 1e-5, approx=False
    )

    # (TN, D) @ (D, C_pad) on the MXU; scale is already folded into w_ref.
    s = jnp.dot(x, w_ref[...], preferred_element_type=jnp.float32)

    # Row-wise normalization applied post-matmul: scales TN*C_pad elements
    # instead of TN*D.
    o_ref[...] = (s * inv_norm).astype(o_ref.dtype)


def _round_up(v, m):
    return ((v + m - 1) // m) * m


def _vmem_budget():
    """(per_x_buffer_cap_bytes, vmem_limit_bytes, tn_cap) derived from the chip."""
    try:
        cap = pltpu.get_tpu_info().vmem_capacity_bytes
    except Exception:
        cap = 64 * 1024 * 1024  # conservative fallback (v7x per-TC VMEM)
    if cap >= 100 * 1024 * 1024:
        # v5e / v6e: 128 MiB VMEM -> bigger tiles, fewer grid steps.
        return 8 * 1024 * 1024, 64 * 1024 * 1024, 1024
    # v7x: 64 MiB per TensorCore -> stay conservative.
    return 4 * 1024 * 1024, 32 * 1024 * 1024, 512


def cosine_sim_output_layer(x, weight, scale):
    """JAX wrapper matching CosineSimOutputLayers.forward.

    x      : (N, D) or (N, C, H, W) features (flattened if >2D), any float dtype
    weight : (num_classes + 1, D) classifier weight (no bias)
    scale  : python float / 0-d scalar, cfg.MODEL.ROI_HEADS.COSINE_SCALE
    returns: (N, num_classes + 1) scaled cosine scores, x.dtype
    """
    if x.ndim > 2:
        x = x.reshape(x.shape[0], -1)
    n, d = x.shape
    c = weight.shape[0]
    assert weight.shape[1] == d

    # ---- weight preprocessing (once, tiny C x D tensor; hoisted out of the
    # streamed grid): L2-normalize rows, fold in the scale, pad the class dim to
    # a full lane width (dense stores / full MXU tile), pre-transpose to (D, C_pad)
    # so the kernel needs no per-step XLU transpose of the resident weight.
    w_f32 = weight.astype(jnp.float32)
    w_norm = jnp.sqrt(jnp.sum(w_f32 * w_f32, axis=1, keepdims=True))
    w_n = (jnp.float32(scale) * w_f32) / (w_norm + 1e-5)

    c_pad = _round_up(max(c, _LANE), _LANE)
    if c_pad != c:
        w_n = jnp.pad(w_n, ((0, c_pad - c), (0, 0)))
    w_t = w_n.T  # (D, C_pad)

    # ---- N-tile selection, generation aware.
    per_buf_cap, vmem_limit, tn_cap = _vmem_budget()
    x_itemsize = jnp.dtype(x.dtype).itemsize
    max_tn_for_vmem = max(
        _SUBLANE, (per_buf_cap // max(1, d * x_itemsize)) // _SUBLANE * _SUBLANE
    )
    tn = min(tn_cap, _round_up(n, _SUBLANE), max_tn_for_vmem)
    # Keep >= 2 grid steps whenever N allows so both v7x TensorCores get work.
    tn = min(tn, max(_SUBLANE, _round_up(pl.cdiv(n, 2), _SUBLANE)))
    tn = max(_SUBLANE, tn)

    grid = (pl.cdiv(n, tn),)
    out_dtype = x.dtype

    out = pl.pallas_call(
        _cosine_sim_kernel,
        out_shape=jax.ShapeDtypeStruct((n, c_pad), out_dtype),
        grid=grid,
        in_specs=[
            # streamed feature tiles, native dtype (no wrapper pad / no upcast copy)
            pl.BlockSpec((tn, d), lambda i: (i, 0)),
            # resident weight: constant block index -> single-buffered
            pl.BlockSpec((d, c_pad), lambda i: (0, 0), pipeline_mode=pl.Buffered(1)),
        ],
        out_specs=pl.BlockSpec((tn, c_pad), lambda i: (i, 0)),
        compiler_params=pltpu.CompilerParams(
            dimension_semantics=("parallel",),  # 2-TC sharding on v7x
            vmem_limit_bytes=vmem_limit,
        ),
        cost_estimate=pl.CostEstimate(
            flops=2 * n * d * c_pad + 3 * n * d + n * c_pad,
            transcendentals=2 * n,
            bytes_accessed=n * d * x_itemsize
            + d * c_pad * 4
            + n * c_pad * jnp.dtype(out_dtype).itemsize,
        ),
    )(x, w_t)

    # strip class padding before anything downstream (e.g. softmax).
    return out[:, :c]


if __name__ == "__main__":
    key = jax.random.PRNGKey(0)
    k_x, k_w = jax.random.split(key)

    # Small shapes consistent with the module: NCHW features, 10 fg classes.
    batch, chans, h, w = 2, 4, 16, 16          # x: (2, 4, 16, 16) -> D = 1024
    num_classes = 10                            # cls_score: (11, 1024)
    input_size = chans * h * w

    x = jax.random.normal(k_x, (batch, chans, h, w), dtype=jnp.float32)
    # nn.init.normal_(self.cls_score.weight, std=0.01), deterministic here.
    cls_weight = 0.01 * jax.random.normal(
        k_w, (num_classes + 1, input_size), dtype=jnp.float32
    )
    cosine_scale = 20.0  # cfg.MODEL.ROI_HEADS.COSINE_SCALE (fixed, not -1)

    scores = cosine_sim_output_layer(x, cls_weight, cosine_scale)
    scores = jax.block_until_ready(scores)

    # Pure-JAX reference (same math as the PyTorch forward).
    xf = x.reshape(batch, -1)
    xn = xf / (jnp.linalg.norm(xf, axis=1, keepdims=True) + 1e-5)
    wn = cls_weight / (jnp.linalg.norm(cls_weight, axis=1, keepdims=True) + 1e-5)
    ref = cosine_scale * (xn @ wn.T)

    assert scores.shape == (batch, num_classes + 1)
    assert jnp.allclose(scores, ref, atol=1e-4, rtol=1e-4)

    print("KERNEL_OK")
</pallas_src>

<mosaic_0001>
module attributes {stable_mosaic.version = 11 : i64} {
  func.func @_cosine_sim_kernel(%arg0: i32, %arg1: memref<8x1024xf32, #tpu.memory_space<vmem>>, %arg2: memref<1024x128xf32, #tpu.memory_space<vmem>>, %arg3: memref<8x128xf32, #tpu.memory_space<vmem>>) attributes {dimension_semantics = [#tpu.dimension_semantics<parallel>], iteration_bounds = array<i64: 1>, scalar_prefetch = 0 : i64, scratch_operands = 0 : i64, tpu.core_type = #tpu.core_type<tc>, window_params = [{transform_indices = @transform_0, window_bounds = array<i64: 8, 1024>}, {pipeline_mode = #tpu.pipeline_mode<synchronous>, transform_indices = @transform_1, window_bounds = array<i64: 1024, 128>}, {transform_indices = @transform_2, window_bounds = array<i64: 8, 128>}]} {
    %c0 = arith.constant 0 : index
    %c0_0 = arith.constant 0 : index
    %0 = vector.load %arg1[%c0, %c0_0] : memref<8x1024xf32, #tpu.memory_space<vmem>>, vector<8x1024xf32>
    %1 = arith.mulf %0, %0 : vector<8x1024xf32>
    %cst = arith.constant dense<0.000000e+00> : vector<8xf32>
    %2 = vector.multi_reduction <add>, %1, %cst [1] : vector<8x1024xf32> to vector<8xf32>
    %3 = vector.shape_cast %2 : vector<8xf32> to vector<8x1xf32>
    %4 = math.sqrt %3 : vector<8x1xf32>
    %cst_1 = arith.constant 9.99999974E-6 : f32
    %5 = vector.broadcast %cst_1 : f32 to vector<8x1xf32>
    %6 = arith.addf %4, %5 : vector<8x1xf32>
    %7 = tpu.reciprocal %6 : vector<8x1xf32> -> vector<8x1xf32>
    %c0_2 = arith.constant 0 : index
    %c0_3 = arith.constant 0 : index
    %8 = vector.load %arg2[%c0_2, %c0_3] : memref<1024x128xf32, #tpu.memory_space<vmem>>, vector<1024x128xf32>
    %cst_4 = arith.constant dense<0.000000e+00> : vector<8x128xf32>
    %9 = tpu.matmul %0, %8, %cst_4 {dimension_numbers = #tpu.dot_dimension_numbers<[1], [0], [0], [1], [0, 0, 1, 1], [], []>} : vector<8x1024xf32>, vector<1024x128xf32>, vector<8x128xf32> -> vector<8x128xf32>
    %10 = vector.broadcast %7 : vector<8x1xf32> to vector<8x128xf32>
    %11 = arith.mulf %9, %10 : vector<8x128xf32>
    %c0_5 = arith.constant 0 : index
    %c0_6 = arith.constant 0 : index
    %12 = vector.load %arg3[%c0_5, %c0_6] : memref<8x128xf32, #tpu.memory_space<vmem>>, vector<8x128xf32>
    tpu.vector_store %arg3[%c0_5, %c0_6], %11 {strides = array<i32>} : memref<8x128xf32, #tpu.memory_space<vmem>>, vector<8x128xf32>,
    return
  }
  func.func @transform_0(%arg0: i32) -> (i32, i32) {
    %c0_i32 = arith.constant 0 : i32
    %c0_i32_0 = arith.constant 0 : i32
    return %arg0, %c0_i32 : i32, i32
  }
  func.func @transform_1(%arg0: i32) -> (i32, i32) {
    %c0_i32 = arith.constant 0 : i32
    %c0_i32_0 = arith.constant 0 : i32
    %c0_i32_1 = arith.constant 0 : i32
    return %c0_i32, %c0_i32_0 : i32, i32
  }
  func.func @transform_2(%arg0: i32) -> (i32, i32) {
    %c0_i32 = arith.constant 0 : i32
    %c0_i32_0 = arith.constant 0 : i32
    return %arg0, %c0_i32 : i32, i32
  }
}

</mosaic_0001>

<bundles_post_ra>
// kernel: tpu_custom_call.1
= control target key start
LH: loop header
LB: loop body
LE: loop exit
PB: predicated region body
PF: predicated region fallthrough
CT: control target
= control target key end

     0   :  { %7 = vsyncpa [#allocation3], 0  ;;  %s1165_s0 = inlined_call_operand.hbm [shape: f32[2,1024], index: 0, kind: input, shape index: {}]   ;;  %s1166_s1 = inlined_call_operand.hbm [shape: f32[1024,128], index: 1, kind: input, shape index: {}]   ;;  %s1167_s2 = inlined_call_operand.hbm [shape: f32[2,128], index: 2, kind: output, shape index: {}]  }
   0x1   :  { %8 = vsyncpa [#allocation6], 0 }
   0x2   :  { %9 = vsyncpa [#allocation4], 0 }
   0x3   :  { %14 = vsyncadd [#allocation3], 768  ;;  %s1040_s9 = smov [#allocation2]   ;;  %s968_s13 = scalar_lea.hbm %s1165_s0, 256 }
   0x4   :  { %s15_s10 = sshll.u32 %s1040_s9, 4  ;;  %p969_p0 = scmp.ne.s32.totalorder %s1165_s0, %s968_s13  ;;  %s16_s10 = int_to_ptr.vmem [resolvable:$true] %s15_s10 }
   0x5   :  { %p972_p1 = scmp.lt.u32.totalorder %s968_s13, %s1165_s0 }
   0x7   :  { %p974_p2 = pnand %p972_p1, %p969_p0 }
   0x9   :  { %977 = shalt.err (!%p974_p2)
}
   0xa   :  { %s978_s18 = scalar_lea.vmem %s16_s10, 256  ;;  %s982_s19 = scalar_lea.vmem %s16_s10, 1024 }
   0xb   :  { %p979_p3 = scmp.ne.s32.totalorder %s16_s10, %s978_s18  ;;  %p983_p4 = scmp.lt.s32.totalorder %s16_s10, %s16_s10 }
   0xc   :  { %p984_p5 = scmp.lt.s32.totalorder %s982_s19, %s978_s18 }
   0xe   :  { %p985_p6 = por %p984_p5, %p983_p4 }
  0x10   :  { %p986_p7 = pnand %p985_p6, %p979_p3 }
  0x12   :  { %989 = shalt.err (!%p986_p7)
}
  0x13   :  { %s1041_s20 = smov 256   ;;  %s1042_s21 = smov 16  }
  0x14   :  { %21 = dma.hbm_to_vmem [thread:$0]  %s1165_s0, 256, %s16_s10, [#allocation3], %s1041_s20, %s1041_s20, %s1042_s21  }
  0x15   :  { %s1043_s24 = smov [#allocation5]   ;;  %s990_s28 = scalar_lea.hbm %s1166_s1, 16384 }
  0x16   :  { %s27_s25 = sshll.u32 %s1043_s24, 4  ;;  %p991_p8 = scmp.ne.s32.totalorder %s1166_s1, %s990_s28  ;;  %s28_s25 = int_to_ptr.vmem [resolvable:$true] %s27_s25 }
  0x17   :  { %p994_p9 = scmp.lt.u32.totalorder %s990_s28, %s1166_s1 }
  0x19   :  { %p996_p10 = pnand %p994_p9, %p991_p8 }
  0x1b   :  { %999 = shalt.err (!%p996_p10)
}
  0x1c   :  { %s1000_s5 = scalar_lea.vmem %s28_s25, 16384  ;;  %p1005_p12 = scmp.lt.s32.totalorder %s28_s25, %s28_s25 }
  0x1d   :  { %p1001_p11 = scmp.ne.s32.totalorder %s28_s25, %s1000_s5  ;;  %p1006_p13 = scmp.lt.s32.totalorder %s1000_s5, %s1000_s5 }
  0x1f   :  { %p1007_p0 = por %p1006_p13, %p1005_p12 }
  0x21   :  { %p1008_p1 = pnand %p1007_p0, %p1001_p11 }
  0x23   :  { %1011 = shalt.err (!%p1008_p1)
}
  0x24   :  { %s1044_s0 = smov 128   ;;  %s1045_s6 = smov 8  }
  0x25   :  { %33 = dma.hbm_to_vmem [thread:$0]  %s1166_s1, 16384, %s28_s25, [#allocation6], %s1044_s0, %s1044_s0, %s1045_s6  }
  0x26   :  { %1034 = dma.done.wait [#allocation3], 1024  }
  0x27   :  { %1035 = vsyncadd [#allocation3], 4294966272 }
  0x28   :  { %1036 = dma.done.wait [#allocation6], 16384  }
  0x29   :  { %1037 = vsyncadd [#allocation6], 4294950912  ;;  %v178_v0 = vld [vmem:[#allocation5 + $0x80] sm:$0xff]  ;;  %v179_v1 = vld [vmem:[#allocation5 + $0x88] sm:$0xff]  ;;  %v1046_v51 = vmov 1983009808   ;;  %v71_v53 = vlaneseq }
  0x2a   :  { %v210_v2 = vld [vmem:[#allocation5 + $0x180] sm:$0xff]  ;;  %v818_v3 = vpack.c.bf16 %v179_v1, %v178_v0  ;;  %v211_v4 = vld [vmem:[#allocation5 + $0x188] sm:$0xff]  ;;  %v180_v11 = vld [vmem:[#allocation5 + $0x90] sm:$0xff]  ;;  %v69_v52 = vunpack.c.l.s4 %v1046_v51 }
  0x2b   :  { %v162_v5 = vld [vmem:[#allocation5] sm:$0xff]  ;;  %v163_v6 = vld [vmem:[#allocation5 + $0x8] sm:$0xff]  ;;  %v850_v7 = vpack.c.bf16 %v211_v4, %v210_v2  ;;  %v181_v13 = vld [vmem:[#allocation5 + $0x98] sm:$0xff]  ;;  %v72_v4 = vshrl.u32 %v71_v53, 7 }
  0x2c   :  { %v820_v8 = vpack.c.bf16 %v163_v6, %v162_v5  ;;  %v194_v9 = vld [vmem:[#allocation5 + $0x100] sm:$0xff]  ;;  %v195_v10 = vld [vmem:[#allocation5 + $0x108] sm:$0xff]  ;;  %819 = vmatprep.subr.bf16.mxu0 %v818_v3  ;;  %v212_v14 = vld [vmem:[#allocation5 + $0x190] sm:$0xff]  ;;  %v822_v16 = vpack.c.bf16 %v181_v13, %v180_v11  ;;  %v70_v3 = vunpack.c.0.s8 %v69_v52 }
  0x2d   :  { %v852_v12 = vpack.c.bf16 %v195_v10, %v194_v9  ;;  %v213_v15 = vld [vmem:[#allocation5 + $0x198] sm:$0xff]  ;;  %851 = vmatprep.subr.bf16.mxu1 %v850_v7  ;;  %v164_v18 = vld [vmem:[#allocation5 + $0x10] sm:$0xff]  ;;  %v182_v23 = vld [vmem:[#allocation5 + $0xa0] sm:$0xff] }
  0x2e   :  { %821 = vmatpush3.bf16.msra.mxu0 %v820_v8  ;;  %v854_v17 = vpack.c.bf16 %v213_v15, %v212_v14  ;;  %v165_v19 = vld [vmem:[#allocation5 + $0x18] sm:$0xff]  ;;  %v196_v20 = vld [vmem:[#allocation5 + $0x110] sm:$0xff]  ;;  %v183_v24 = vld [vmem:[#allocation5 + $0xa8] sm:$0xff] }
  0x2f   :  { %853 = vmatpush3.bf16.msra.mxu1 %v852_v12  ;;  %v824_v21 = vpack.c.bf16 %v165_v19, %v164_v18  ;;  %v197_v22 = vld [vmem:[#allocation5 + $0x118] sm:$0xff]  ;;  %823 = vmatprep.subr.bf16.mxu0 %v822_v16  ;;  %v826_v26 = vpack.c.bf16 %v183_v24, %v182_v23  ;;  %v214_v27 = vld [vmem:[#allocation5 + $0x1a0] sm:$0xff]  ;;  %v215_v28 = vld [vmem:[#allocation5 + $0x1a8] sm:$0xff] }
  0x30   :  { %855 = vmatprep.subr.bf16.mxu1 %v854_v17  ;;  %v856_v25 = vpack.c.bf16 %v197_v22, %v196_v20  ;;  %v166_v29 = vld [vmem:[#allocation5 + $0x20] sm:$0xff]  ;;  %v858_v30 = vpack.c.bf16 %v215_v28, %v214_v27  ;;  %v167_v31 = vld [vmem:[#allocation5 + $0x28] sm:$0xff]  ;;  %v184_v35 = vld [vmem:[#allocation5 + $0xb0] sm:$0xff]  ;;  %v1089_v20 = vsub.s32 %v70_v3, %v72_v4 }
  0x31   :  { %v198_v32 = vld [vmem:[#allocation5 + $0x120] sm:$0xff]  ;;  %v199_v33 = vld [vmem:[#allocation5 + $0x128] sm:$0xff]  ;;  %v828_v34 = vpack.c.bf16 %v167_v31, %v166_v29  ;;  %v185_v36 = vld [vmem:[#allocation5 + $0xb8] sm:$0xff] }
  0x32   :  { %825 = vmatpush3.bf16.msra.mxu0 %v824_v21  ;;  %v216_v37 = vld [vmem:[#allocation5 + $0x1b0] sm:$0xff]  ;;  %v860_v38 = vpack.c.bf16 %v199_v33, %v198_v32  ;;  %v830_v39 = vpack.c.bf16 %v185_v36, %v184_v35  ;;  %v217_v40 = vld [vmem:[#allocation5 + $0x1b8] sm:$0xff]  ;;  %v186_v46 = vld [vmem:[#allocation5 + $0xc0] sm:$0xff] }
  0x33   :  { %857 = vmatpush3.bf16.msra.mxu1 %v856_v25  ;;  %827 = vmatprep.subr.bf16.mxu0 %v826_v26  ;;  %v168_v41 = vld [vmem:[#allocation5 + $0x30] sm:$0xff]  ;;  %v169_v42 = vld [vmem:[#allocation5 + $0x38] sm:$0xff]  ;;  %v862_v43 = vpack.c.bf16 %v217_v40, %v216_v37  ;;  %v187_v47 = vld [vmem:[#allocation5 + $0xc8] sm:$0xff] }
  0x34   :  { %859 = vmatprep.subr.bf16.mxu1 %v858_v30  ;;  %v200_v44 = vld [vmem:[#allocation5 + $0x130] sm:$0xff]  ;;  %v201_v45 = vld [vmem:[#allocation5 + $0x138] sm:$0xff]  ;;  %v218_v48 = vld [vmem:[#allocation5 + $0x1c0] sm:$0xff]  ;;  %v832_v50 = vpack.c.bf16 %v169_v42, %v168_v41  ;;  %v834_v55 = vpack.c.bf16 %v187_v47, %v186_v46 }
  0x35   :  { %v219_v49 = vld [vmem:[#allocation5 + $0x1c8] sm:$0xff]  ;;  %v864_v54 = vpack.c.bf16 %v201_v45, %v200_v44  ;;  %v170_v56 = vld [vmem:[#allocation5 + $0x40] sm:$0xff]  ;;  %v188_v61 = vld [vmem:[#allocation5 + $0xd0] sm:$0xff] }
  0x36   :  { %829 = vmatpush3.bf16.msra.mxu0 %v828_v34  ;;  %v171_v57 = vld [vmem:[#allocation5 + $0x48] sm:$0xff]  ;;  %v202_v58 = vld [vmem:[#allocation5 + $0x140] sm:$0xff]  ;;  %v866_v59 = vpack.c.bf16 %v219_v49, %v218_v48  ;;  %v189_v62 = vld [vmem:[#allocation5 + $0xd8] sm:$0xff] }
  0x37   :  { %861 = vmatpush3.bf16.msra.mxu1 %v860_v38  ;;  %831 = vmatprep.subr.bf16.mxu0 %v830_v39  ;;  %v203_v60 = vld [vmem:[#allocation5 + $0x148] sm:$0xff]  ;;  %v220_v63 = vld [vmem:[#allocation5 + $0x1d0] sm:$0xff]  ;;  %v221_v0 = vld [vmem:[#allocation5 + $0x1d8] sm:$0xff]  ;;  %v836_v1 = vpack.c.bf16 %v171_v57, %v170_v56  ;;  %v838_v6 = vpack.c.bf16 %v189_v62, %v188_v61 }
  0x38   :  { %863 = vmatprep.subr.bf16.mxu1 %v862_v43  ;;  %v172_v2 = vld [vmem:[#allocation5 + $0x50] sm:$0xff]  ;;  %v868_v5 = vpack.c.bf16 %v203_v60, %v202_v58  ;;  %v173_v7 = vld [vmem:[#allocation5 + $0x58] sm:$0xff]  ;;  %v870_v10 = vpack.c.bf16 %v221_v0, %v220_v63  ;;  %v190_v11 = vld [vmem:[#allocation5 + $0xe0] sm:$0xff] }
  0x39   :  { %v204_v8 = vld [vmem:[#allocation5 + $0x150] sm:$0xff]  ;;  %v205_v9 = vld [vmem:[#allocation5 + $0x158] sm:$0xff]  ;;  %v191_v12 = vld [vmem:[#allocation5 + $0xe8] sm:$0xff]  ;;  %v840_v17 = vpack.c.bf16 %v173_v7, %v172_v2 }
  0x3a   :  { %833 = vmatpush3.bf16.msra.mxu0 %v832_v50  ;;  %v222_v13 = vld [vmem:[#allocation5 + $0x1e0] sm:$0xff]  ;;  %v223_v14 = vld [vmem:[#allocation5 + $0x1e8] sm:$0xff]  ;;  %v872_v21 = vpack.c.bf16 %v205_v9, %v204_v8  ;;  %v842_v22 = vpack.c.bf16 %v191_v12, %v190_v11  ;;  %v192_v23 = vld [vmem:[#allocation5 + $0xf0] sm:$0xff] }
  0x3b   :  { %865 = vmatpush3.bf16.msra.mxu1 %v864_v54  ;;  %835 = vmatprep.subr.bf16.mxu0 %v834_v55  ;;  %v174_v15 = vld [vmem:[#allocation5 + $0x60] sm:$0xff]  ;;  %v175_v16 = vld [vmem:[#allocation5 + $0x68] sm:$0xff]  ;;  %v42_v25 = vld [vmem:[#allocation2 + $0x10] sm:$0xff]  ;;  %v874_v26 = vpack.c.bf16 %v223_v14, %v222_v13 }
  0x3c   :  { %867 = vmatprep.subr.bf16.mxu1 %v866_v59  ;;  %v206_v18 = vld [vmem:[#allocation5 + $0x160] sm:$0xff]  ;;  %v207_v19 = vld [vmem:[#allocation5 + $0x168] sm:$0xff]  ;;  %v844_v27 = vpack.c.bf16 %v175_v16, %v174_v15  ;;  %v193_v28 = vld [vmem:[#allocation5 + $0xf8] sm:$0xff]  ;;  %v1093_v35 = vmul.f32 %v42_v25, %v42_v25 }
  0x3d   :  { %v40_v24 = vld [vmem:[#allocation2] sm:$0xff]  ;;  %v46_v30 = vld [vmem:[#allocation2 + $0x30] sm:$0xff]  ;;  %v225_v33 = vld [vmem:[#allocation5 + $0x1f8] sm:$0xff]  ;;  %v876_v42 = vpack.c.bf16 %v207_v19, %v206_v18  ;;  %v846_v43 = vpack.c.bf16 %v193_v28, %v192_v23 }
  0x3e   :  { %837 = vmatpush3.bf16.msra.mxu0 %v836_v1  ;;  %v44_v29 = vld [vmem:[#allocation2 + $0x20] sm:$0xff]  ;;  %v298_v31 = vcombine.low %v40_v24, %v42_v25  ;;  %v224_v32 = vld [vmem:[#allocation5 + $0x1f0] sm:$0xff]  ;;  %v1091_v34 = vmul.f32 %v40_v24, %v40_v24  ;;  %v299_v37 = vcombine.high %v40_v24, %v42_v25  ;;  %v1097_v39 = vmul.f32 %v46_v30, %v46_v30  ;;  %v177_v45 = vld [vmem:[#allocation5 + $0x78] sm:$0xff] }
  0x3f   :  { %869 = vmatpush3.bf16.msra.mxu1 %v868_v5  ;;  %839 = vmatprep.subr.bf16.mxu0 %v838_v6  ;;  %v300_v36 = vcombine.low %v44_v29, %v46_v30  ;;  %v1095_v38 = vmul.f32 %v44_v29, %v44_v29  ;;  %v301_v41 = vcombine.high %v44_v29, %v46_v30  ;;  %v176_v44 = vld [vmem:[#allocation5 + $0x70] sm:$0xff]  ;;  %v209_v49 = vld [vmem:[#allocation5 + $0x178] sm:$0xff]  ;;  %v242_v52 = vld [vmem:[#allocation5 + $0x280] sm:$0xff] }
  0x40   :  { %871 = vmatprep.subr.bf16.mxu1 %v870_v10  ;;  %v308_v40 = vrot.slane %v298_v31, %v1089_v20  ;;  %v208_v46 = vld [vmem:[#allocation5 + $0x170] sm:$0xff]  ;;  %v878_v48 = vpack.c.bf16 %v225_v33, %v224_v32  ;;  %v315_v50 = vrot.slane %v299_v37, %v1089_v20  ;;  %v243_v53 = vld [vmem:[#allocation5 + $0x288] sm:$0xff]  ;;  %v274_v55 = vld [vmem:[#allocation5 + $0x380] sm:$0xff]  ;;  %v848_v57 = vpack.c.bf16 %v177_v45, %v176_v44 }
  0x41   :  { %v322_v47 = vrot.slane %v300_v36, %v1089_v20  ;;  %v329_v51 = vrot.slane %v301_v41, %v1089_v20  ;;  %v275_v56 = vld [vmem:[#allocation5 + $0x388] sm:$0xff]  ;;  %v64_v58 = vcombine.low %v1091_v34, %v1093_v35  ;;  %v66_v59 = vcombine.low %v1095_v38, %v1097_v39  ;;  %v226_v63 = vld [vmem:[#allocation5 + $0x200] sm:$0xff]  ;;  %v244_v4 = vld [vmem:[#allocation5 + $0x290] sm:$0xff] }
  0x42   :  { %841 = vmatpush3.bf16.msra.mxu0 %v840_v17  ;;  %v880_v61 = vpack.c.bf16 %v209_v49, %v208_v46  ;;  %v882_v62 = vpack.c.bf16 %v243_v53, %v242_v52  ;;  %v227_v0 = vld [vmem:[#allocation5 + $0x208] sm:$0xff]  ;;  %v258_v1 = vld [vmem:[#allocation5 + $0x300] sm:$0xff]  ;;  %v914_v2 = vpack.c.bf16 %v275_v56, %v274_v55  ;;  %v245_v5 = vld [vmem:[#allocation5 + $0x298] sm:$0xff]  ;;  %v65_v6 = vcombine.high %v1091_v34, %v1093_v35 }
  0x43   :  { %873 = vmatpush3.bf16.msra.mxu1 %v872_v21  ;;  %843 = vmatprep.subr.bf16.mxu0 %v842_v22  ;;  %v331_v54 = vcombine.high %v308_v40, %v322_v47  ;;  %v333_v60 = vcombine.high %v315_v50, %v329_v51  ;;  %v259_v3 = vld [vmem:[#allocation5 + $0x308] sm:$0xff]  ;;  %v67_v7 = vcombine.high %v1095_v38, %v1097_v39  ;;  %v276_v9 = vld [vmem:[#allocation5 + $0x390] sm:$0xff]  ;;  %v277_v10 = vld [vmem:[#allocation5 + $0x398] sm:$0xff] }
  0x44   :  { %875 = vmatprep.subr.bf16.mxu1 %v874_v26  ;;  %v330_v8 = vcombine.low %v308_v40, %v322_v47  ;;  %v74_v11 = vrot.slane %v64_v58, %v1089_v20  ;;  %v88_v12 = vrot.slane %v66_v59, %v1089_v20  ;;  %v332_v13 = vcombine.low %v315_v50, %v329_v51  ;;  %v228_v15 = vld [vmem:[#allocation5 + $0x210] sm:$0xff]  ;;  %v229_v16 = vld [vmem:[#allocation5 + $0x218] sm:$0xff]  ;;  %v246_v23 = vld [vmem:[#allocation5 + $0x2a0] sm:$0xff] }
  0x45   :  { %442 = vmatprep.mubr.f32.mxu0 %v331_v54  ;;  %512 = vmatprep.mubr.f32.mxu1 %v333_v60  ;;  %v884_v14 = vpack.c.bf16 %v227_v0, %v226_v63  ;;  %v916_v17 = vpack.c.bf16 %v259_v3, %v258_v1  ;;  %v886_v18 = vpack.c.bf16 %v245_v5, %v244_v4  ;;  %v260_v19 = vld [vmem:[#allocation5 + $0x310] sm:$0xff]  ;;  %v261_v22 = vld [vmem:[#allocation5 + $0x318] sm:$0xff]  ;;  %v247_v24 = vld [vmem:[#allocation5 + $0x2a8] sm:$0xff] }
  0x46   :  { %845 = vmatpush3.bf16.msra.mxu0 %v844_v27  ;;  %v918_v21 = vpack.c.bf16 %v277_v10, %v276_v9  ;;  %v888_v25 = vpack.c.bf16 %v229_v16, %v228_v15  ;;  %v278_v26 = vld [vmem:[#allocation5 + $0x3a0] sm:$0xff]  ;;  %v279_v27 = vld [vmem:[#allocation5 + $0x3a8] sm:$0xff]  ;;  %v1114_v28 = vrot.slane %v65_v6, %v1089_v20  ;;  %v1117_v32 = vrot.slane %v67_v7, %v1089_v20  ;;  %v248_v38 = vld [vmem:[#allocation5 + $0x2b0] sm:$0xff] }
  0x47   :  { %877 = vmatpush3.bf16.msra.mxu1 %v876_v42  ;;  %847 = vmatprep.subr.bf16.mxu0 %v846_v43  ;;  %v230_v29 = vld [vmem:[#allocation5 + $0x220] sm:$0xff]  ;;  %v231_v30 = vld [vmem:[#allocation5 + $0x228] sm:$0xff]  ;;  %v96_v33 = vcombine.low %v74_v11, %v88_v12  ;;  %v97_v34 = vcombine.high %v74_v11, %v88_v12  ;;  %v920_v35 = vpack.c.bf16 %v261_v22, %v260_v19  ;;  %v249_v39 = vld [vmem:[#allocation5 + $0x2b8] sm:$0xff] }
  0x48   :  { %879 = vmatprep.subr.bf16.mxu1 %v878_v48  ;;  %v262_v31 = vld [vmem:[#allocation5 + $0x320] sm:$0xff]  ;;  %v890_v36 = vpack.c.bf16 %v247_v24, %v246_v23  ;;  %v263_v37 = vld [vmem:[#allocation5 + $0x328] sm:$0xff]  ;;  %v922_v40 = vpack.c.bf16 %v279_v27, %v278_v26  ;;  %v232_v41 = vld [vmem:[#allocation5 + $0x230] sm:$0xff]  ;;  %v892_v47 = vpack.c.bf16 %v231_v30, %v230_v29  ;;  %v98_v51 = vcombine.low %v1114_v28, %v1117_v32 }
  0x49   :  { %v233_v42 = vld [vmem:[#allocation5 + $0x238] sm:$0xff]  ;;  %v280_v43 = vld [vmem:[#allocation5 + $0x3b0] sm:$0xff]  ;;  %v250_v48 = vld [vmem:[#allocation5 + $0x2c0] sm:$0xff]  ;;  %v144_v52 = vadd.f32 %v97_v34, %v96_v33  ;;  %v924_v53 = vpack.c.bf16 %v263_v37, %v262_v31  ;;  %v894_v54 = vpack.c.bf16 %v249_v39, %v248_v38  ;;  %v99_v63 = vcombine.high %v1114_v28, %v1117_v32 }
  0x4a   :  { %849 = vmatpush3.bf16.msra.mxu0 %v848_v57  ;;  %v281_v44 = vld [vmem:[#allocation5 + $0x3b8] sm:$0xff]  ;;  %v264_v45 = vld [vmem:[#allocation5 + $0x330] sm:$0xff]  ;;  %v251_v49 = vld [vmem:[#allocation5 + $0x2c8] sm:$0xff]  ;;  %v896_v59 = vpack.c.bf16 %v233_v42, %v232_v41 }
  0x4b   :  { %881 = vmatpush3.bf16.msra.mxu1 %v880_v61  ;;  %883 = vmatprep.subr.bf16.mxu0 %v882_v62  ;;  %v265_v46 = vld [vmem:[#allocation5 + $0x338] sm:$0xff]  ;;  %v1119_v50 = vld [vmem:[#allocation5 + $0x240] sm:$0xff]  ;;  %v1123_v55 = vld [vmem:[#allocation5 + $0x248] sm:$0xff]  ;;  %v926_v58 = vpack.c.bf16 %v281_v44, %v280_v43  ;;  %v898_v0 = vpack.c.bf16 %v251_v49, %v250_v48  ;;  %v145_v6 = vadd.f32 %v144_v52, %v98_v51 }
  0x4c   :  { %915 = vmatprep.subr.bf16.mxu1 %v914_v2  ;;  %v282_v56 = vld [vmem:[#allocation5 + $0x3c0] sm:$0xff]  ;;  %v283_v57 = vld [vmem:[#allocation5 + $0x3c8] sm:$0xff]  ;;  %v928_v60 = vpack.c.bf16 %v265_v46, %v264_v45  ;;  %v900_v1 = vpack.c.bf16 %v1123_v55, %v1119_v50  ;;  %v43_v4 = vld [vmem:[#allocation2 + $0x18] sm:$0xff] }
  0x4d   :  { %443 = vmatmul.mubr.f32.vlgmr.msra.gmra.mrb[0].mxu0 %v330_v8  ;;  %v266_v61 = vld [vmem:[#allocation5 + $0x340] sm:$0xff]  ;;  %v267_v62 = vld [vmem:[#allocation5 + $0x348] sm:$0xff]  ;;  %v930_v2 = vpack.c.bf16 %v283_v57, %v282_v56  ;;  %v47_v7 = vld [vmem:[#allocation2 + $0x38] sm:$0xff]  ;;  %v51_v15 = vmul.f32 %v43_v4, %v43_v4 }
  0x4e   :  { %513 = vmatmul.mubr.f32.vlgmr.msra.gmra.mrb[0].mxu1 %v332_v13  ;;  %885 = vmatpush3.bf16.msra.mxu0 %v884_v14  ;;  %v41_v3 = vld [vmem:[#allocation2 + $0x8] sm:$0xff]  ;;  %v252_v11 = vld [vmem:[#allocation5 + $0x2d0] sm:$0xff]  ;;  %v253_v12 = vld [vmem:[#allocation5 + $0x2d8] sm:$0xff]  ;;  %v55_v23 = vmul.f32 %v47_v7, %v47_v7 }
  0x4f   :  { %917 = vmatpush3.bf16.msra.mxu1 %v916_v17  ;;  %887 = vmatprep.subr.bf16.mxu0 %v886_v18  ;;  %v45_v5 = vld [vmem:[#allocation2 + $0x28] sm:$0xff]  ;;  %v334_v8 = vcombine.low %v41_v3, %v43_v4  ;;  %v335_v9 = vcombine.high %v41_v3, %v43_v4  ;;  %v49_v10 = vmul.f32 %v41_v3, %v41_v3  ;;  %v284_v18 = vld [vmem:[#allocation5 + $0x3d0] sm:$0xff]  ;;  %v285_v19 = vld [vmem:[#allocation5 + $0x3d8] sm:$0xff] }
  0x50   :  { %919 = vmatprep.subr.bf16.mxu1 %v918_v21  ;;  %v336_v13 = vcombine.low %v45_v5, %v47_v7  ;;  %v337_v14 = vcombine.high %v45_v5, %v47_v7  ;;  %v53_v16 = vmul.f32 %v45_v5, %v45_v5  ;;  %v932_v17 = vpack.c.bf16 %v267_v62, %v266_v61  ;;  %v236_v24 = vld [vmem:[#allocation5 + $0x250] sm:$0xff]  ;;  %v237_v30 = vld [vmem:[#allocation5 + $0x258] sm:$0xff]  ;;  %v255_v37 = vld [vmem:[#allocation5 + $0x2e8] sm:$0xff] }
  0x51   :  { %v1130_v21 = vrot.slane %v334_v8, %v1089_v20  ;;  %v1133_v22 = vrot.slane %v335_v9, %v1089_v20  ;;  %v100_v27 = vcombine.low %v49_v10, %v51_v15  ;;  %v101_v28 = vcombine.high %v49_v10, %v51_v15  ;;  %v268_v31 = vld [vmem:[#allocation5 + $0x350] sm:$0xff]  ;;  %v269_v32 = vld [vmem:[#allocation5 + $0x358] sm:$0xff]  ;;  %v286_v41 = vld [vmem:[#allocation5 + $0x3e0] sm:$0xff] }
  0x52   :  { %889 = vmatpush3.bf16.msra.mxu0 %v888_v25  ;;  %v1136_v25 = vrot.slane %v336_v13, %v1089_v20  ;;  %v1139_v26 = vrot.slane %v337_v14, %v1089_v20  ;;  %v902_v29 = vpack.c.bf16 %v253_v12, %v252_v11  ;;  %v102_v33 = vcombine.low %v53_v16, %v55_v23  ;;  %v287_v42 = vld [vmem:[#allocation5 + $0x3e8] sm:$0xff]  ;;  %v238_v49 = vld [vmem:[#allocation5 + $0x260] sm:$0xff]  ;;  %v256_v57 = vld [vmem:[#allocation5 + $0x2f0] sm:$0xff] }
  0x53   :  { %921 = vmatpush3.bf16.msra.mxu1 %v920_v35  ;;  %891 = vmatprep.subr.bf16.mxu0 %v890_v36  ;;  %v103_v34 = vcombine.high %v53_v16, %v55_v23  ;;  %v934_v35 = vpack.c.bf16 %v285_v19, %v284_v18  ;;  %v254_v36 = vld [vmem:[#allocation5 + $0x2e0] sm:$0xff]  ;;  %v110_v43 = vrot.slane %v100_v27, %v1089_v20  ;;  %v239_v51 = vld [vmem:[#allocation5 + $0x268] sm:$0xff]  ;;  %v273_v7 = vld [vmem:[#allocation5 + $0x378] sm:$0xff] }
  0x54   :  { %923 = vmatprep.subr.bf16.mxu1 %v922_v40  ;;  %v367_v38 = vcombine.high %v1130_v21, %v1136_v25  ;;  %v369_v39 = vcombine.high %v1133_v22, %v1139_v26  ;;  %v146_v40 = vadd.f32 %v145_v6, %v99_v63  ;;  %v117_v44 = vrot.slane %v101_v28, %v1089_v20  ;;  %v270_v52 = vld [vmem:[#allocation5 + $0x360] sm:$0xff]  ;;  %v272_v6 = vld [vmem:[#allocation5 + $0x370] sm:$0xff] }
  0x55   :  { %v124_v45 = vrot.slane %v102_v33, %v1089_v20  ;;  %v131_v46 = vrot.slane %v103_v34, %v1089_v20  ;;  %v936_v48 = vpack.c.bf16 %v269_v32, %v268_v31  ;;  %v906_v50 = vpack.c.bf16 %v255_v37, %v254_v36  ;;  %v289_v20 = vld [vmem:[#allocation5 + $0x3f8] sm:$0xff] }
  0x56   :  { %893 = vmatpush3.bf16.msra.mxu0 %v892_v47  ;;  %v904_v47 = vpack.c.bf16 %v237_v30, %v236_v24  ;;  %582 = vmatprep.mubr.f32.mxu0 %v367_v38  ;;  %v938_v56 = vpack.c.bf16 %v287_v42, %v286_v41  ;;  %v908_v62 = vpack.c.bf16 %v239_v51, %v238_v49 }
  0x57   :  { %925 = vmatpush3.bf16.msra.mxu1 %v924_v53  ;;  %895 = vmatprep.subr.bf16.mxu0 %v894_v54  ;;  %v271_v53 = vld [vmem:[#allocation5 + $0x368] sm:$0xff]  ;;  %v132_v54 = vcombine.low %v110_v43, %v124_v45  ;;  %v133_v55 = vcombine.high %v110_v43, %v124_v45  ;;  %v135_v3 = vcombine.high %v117_v44, %v131_v46 }
  0x58   :  { %927 = vmatprep.subr.bf16.mxu1 %v926_v58  ;;  %v257_v58 = vld [vmem:[#allocation5 + $0x2f8] sm:$0xff]  ;;  %652 = vmatprep.mubr.f32.mxu1 %v369_v39  ;;  %v940_v63 = vpack.c.bf16 %v271_v53, %v270_v52  ;;  %v944_v10 = vpack.c.bf16 %v273_v7, %v272_v6  ;;  %v366_v12 = vcombine.low %v1130_v21, %v1136_v25 }
  0x59   :  { %v147_v61 = vadd.f32 %v146_v40, %v132_v54  ;;  %v368_v13 = vcombine.low %v1133_v22, %v1139_v26 }
  0x5a   :  { %897 = vmatpush3.bf16.msra.mxu0 %v896_v59  ;;  %v288_v59 = vld [vmem:[#allocation5 + $0x3f0] sm:$0xff] }
  0x5b   :  { %929 = vmatpush3.bf16.msra.mxu1 %v928_v60  ;;  %899 = vmatprep.subr.bf16.mxu0 %v898_v0  ;;  %v134_v60 = vcombine.low %v117_v44, %v131_v46  ;;  %v910_v0 = vpack.c.bf16 %v257_v58, %v256_v57  ;;  %v148_v4 = vadd.f32 %v147_v61, %v133_v55 }
  0x5c   :  { %931 = vmatprep.subr.bf16.mxu1 %v930_v2  ;;  %v241_v2 = vld [vmem:[#allocation5 + $0x278] sm:$0xff]  ;;  %v942_v5 = vpack.c.bf16 %v289_v20, %v288_v59 }
  0x5d   :  { %v149_v8 = vadd.f32 %v148_v4, %v134_v60 }
  0x5e   :  { %901 = vmatpush3.bf16.msra.mxu0 %v900_v1  ;;  %v240_v1 = vld [vmem:[#allocation5 + $0x270] sm:$0xff] }
  0x5f   :  { %933 = vmatpush3.bf16.msra.mxu1 %v932_v17  ;;  %903 = vmatprep.subr.bf16.mxu0 %v902_v29  ;;  %v912_v9 = vpack.c.bf16 %v241_v2, %v240_v1  ;;  %v150_v11 = vadd.f32 %v149_v8, %v135_v3 }
  0x60   :  { %935 = vmatprep.subr.bf16.mxu1 %v934_v35 }
  0x61   :  { %151 = vadd.xlane.f32.xlu0 %v150_v11 }
  0x62   :  { %905 = vmatpush3.bf16.msra.mxu0 %v904_v47 }
  0x63   :  { %937 = vmatpush3.bf16.msra.mxu1 %v936_v48  ;;  %907 = vmatprep.subr.bf16.mxu0 %v906_v50 }
  0x64   :  { %939 = vmatprep.subr.bf16.mxu1 %v938_v56 }
  0x66   :  { %909 = vmatpush3.bf16.msra.mxu0 %v908_v62 }
  0x67   :  { %941 = vmatpush3.bf16.msra.mxu1 %v940_v63  ;;  %911 = vmatprep.subr.bf16.mxu0 %v910_v0 }
  0x68   :  { %943 = vmatprep.subr.bf16.mxu1 %v942_v5 }
  0x6a   :  { %913 = vmatpush3.bf16.msra.mxu0 %v912_v9 }
  0x6b   :  { %945 = vmatpush3.bf16.msra.mxu1 %v944_v10 }
  0x6d   :  { %583 = vmatmul.mubr.f32.vlgmr.msra.gmra.mrb[2].mxu0 %v366_v12 }
  0x6e   :  { %653 = vmatmul.mubr.f32.vlgmr.msra.gmra.mrb[2].mxu1 %v368_v13 }
  0xee   :  { %v152_v14 = vpop.xlane.xlu0 %151 }
  0xef   :  { %964 = vrsqrt.f32 %v152_v14  ;;  %vm155_vm0 = vcmp.eq.f32.partialorder %v152_v14, inf  ;;  %v158_v21 = vand.u32 2147483648, %v152_v14  ;;  %vm157_vm1 = vcmp.eq.f32.partialorder %v152_v14, 0.0 }
  0xf9   :  { %v965_v27 = vpop.eup %964 }
  0xfa   :  { %v154_v28 = vmul.f32 %v965_v27, %v152_v14 }
  0xfc   :  { %v156_v25 = vsel %vm155_vm0, %v152_v14, %v154_v28 }
  0xfd   :  { %v159_v29 = vsel %vm157_vm1, %v158_v21, %v156_v25 }
  0xfe   :  { %v160_v22 = vadd.f32 1e-05, %v159_v29 }
 0x100   :  { %966 = vrcp.f32 %v160_v22 }
 0x10a   :  { %v967_v37 = vpop.eup %966 }
 0x120   :  { %v710_v15 = vpop.f32.mrb[0].mxu0 }
 0x121   :  { %v745_v16 = vpop.f32.mrb[0].mxu1  ;;  %v711_v17 = vpop.f32.mrb[1].mxu0 }
 0x122   :  { %v712_v18 = vadd.f32 %v711_v17, %v710_v15  ;;  %v746_v19 = vpop.f32.mrb[1].mxu1 }
 0x123   :  { %v747_v23 = vadd.f32 %v746_v19, %v745_v16 }
 0x125   :  { %v515_v24 = vadd.f32 %v747_v23, %v712_v18 }
 0x140   :  { %v780_v26 = vpop.f32.mrb[2].mxu0 }
 0x141   :  { %v781_v30 = vpop.f32.mrb[3].mxu0  ;;  %v815_v31 = vpop.f32.mrb[2].mxu1 }
 0x142   :  { %v782_v32 = vadd.f32 %v781_v30, %v780_v26  ;;  %v816_v33 = vpop.f32.mrb[3].mxu1 }
 0x143   :  { %v817_v34 = vadd.f32 %v816_v33, %v815_v31 }
 0x144   :  { %v585_v35 = vadd.f32 %v782_v32, %v515_v24 }
 0x146   :  { %v655_v36 = vadd.f32 %v817_v34, %v585_v35 }
 0x148   :  { %v658_v38 = vmul.f32 %v967_v37, %v655_v36 }
 0x14a   :  { %659 = vst [vmem:[#allocation7] sm:$0xff] %v658_v38 }
 0x14b   :  { %664 = vsyncadd [#allocation4], 96  ;;  %s1047_s1 = smov [#allocation7]  }
 0x14c   :  { %s665_s9 = sshll.u32 %s1047_s1, 4  ;;  %s666_s9 = int_to_ptr.vmem [resolvable:$true] %s665_s9 }
 0x14d   :  { %s1012_s10 = scalar_lea.vmem %s666_s9, 32  ;;  %s1016_s11 = scalar_lea.vmem %s666_s9, 128 }
 0x14e   :  { %p1013_p2 = scmp.ne.s32.totalorder %s666_s9, %s1012_s10  ;;  %p1017_p3 = scmp.lt.s32.totalorder %s666_s9, %s666_s9 }
 0x14f   :  { %p1018_p4 = scmp.lt.s32.totalorder %s1016_s11, %s1012_s10 }
 0x151   :  { %p1019_p5 = por %p1018_p4, %p1017_p3 }
 0x153   :  { %p1020_p6 = pnand %p1019_p5, %p1013_p2 }
 0x155   :  { %1023 = shalt.err (!%p1020_p6)
}
 0x156   :  { %s1024_s14 = scalar_lea.hbm %s1167_s2, 32 }
 0x157   :  { %p1025_p7 = scmp.ne.s32.totalorder %s1167_s2, %s1024_s14  ;;  %p1028_p8 = scmp.lt.u32.totalorder %s1024_s14, %s1167_s2 }
 0x159   :  { %p1030_p9 = pnand %p1028_p8, %p1025_p7 }
 0x15b   :  { %1033 = shalt.err (!%p1030_p9)
}
 0x15c   :  { %s1048_s19 = smov 32   ;;  %s1049_s20 = smov 2  }
 0x15d   :  { %671 = dma.vmem_to_hbm [thread:$0]  %s666_s9, 32, %s1167_s2, [#allocation4], %s1048_s19, %s1048_s19, %s1049_s20  }
 0x15e   :  { %1038 = dma.done.wait [#allocation4], 128  }
 0x15f   :  { %1039 = vsyncadd [#allocation4], 4294967168 }
 0x160   :  { %675 = vsyncpa [#allocation3], 1 }
 0x161   :  { %676 = vsyncpa [#allocation6], 1 }
 0x162   :  { %677 = vsyncpa [#allocation4], 1 }

</bundles_post_ra>
